<compile_context>
chip_gen: v5e
topology: v5e:2x2
jax: 0.10.0
libtpu: 0.0.40
codegen_flags: <defaults>
</compile_context>

<pallas_src>
import jax
import jax.numpy as jnp
import numpy as np
from jax.experimental import pallas as pl
from jax.experimental.pallas import tpu as pltpu


def _shrinkage_se_kernel(x_ref, w1_ref, b1_ref, w2_ref, b2_ref, o_ref):
    x = x_ref[...]                                   # (TB, C, L)
    xf = x.astype(jnp.float32)
    x_abs = jnp.abs(xf)

    # AdaptiveAvgPool1d(1) == mean over the length (lane) axis, f32 accumulation.
    avg = jnp.mean(x_abs, axis=-1)                   # (TB, C)

    # fc: Linear(C,C) -> ReLU -> Linear(C,C) -> Sigmoid
    # Weights are passed pre-transposed as (in, out) for row-major MXU matmuls.
    h = jnp.dot(avg, w1_ref[...], preferred_element_type=jnp.float32) + b1_ref[...]
    h = jnp.maximum(h, 0.0)
    t = jnp.dot(h, w2_ref[...], preferred_element_type=jnp.float32) + b2_ref[...]
    t = jax.nn.sigmoid(t)                            # (TB, C)

    thr2d = avg * t                                  # (TB, C) — single broadcast below
    n_sub = jnp.maximum(x_abs - thr2d[:, :, None], 0.0)   # (TB, C, L)

    # sign(x) * n_sub without jnp.sign: n_sub >= 0, and n_sub == 0 when x == 0,
    # so a single select reproduces the sign semantics exactly.
    out = jnp.where(xf >= 0.0, n_sub, -n_sub)
    o_ref[...] = out.astype(o_ref.dtype)


def shrinkage_se(x, w1, b1, w2, b2, *, block_b=None):
    """x: (B, C, L).  w1, w2: (C, C) pre-transposed to (in, out).  b1, b2: (1, C)."""
    B, C, L = x.shape
    elem_bytes = np.dtype(x.dtype).itemsize

    if block_b is None:
        # Budget: 2 buffers x (input + output) x TB*C*L*itemsize must stay well
        # under v7x's 32 MiB scoped-VMEM default; leave headroom at 8 MiB.
        bytes_per_row = C * L * elem_bytes
        vmem_rows = max(1, (8 * 1024 * 1024) // (4 * bytes_per_row))
        # Keep at least 2 grid steps when B allows it (pipelining + v7x megacore).
        block_b = max(1, min(vmem_rows, B // 2 if B >= 2 else B))
    # Keep the batch tile an exact divisor of B (avoids ragged-edge handling).
    while B % block_b:
        block_b -= 1
    grid = (B // block_b,)

    cost = pl.CostEstimate(
        flops=2 * 2 * B * C * C + 4 * B * C * L,      # two FC matmuls + elementwise
        transcendentals=B * C,                        # sigmoid
        bytes_accessed=2 * B * C * L * elem_bytes + 2 * C * C * 4 + 2 * C * 4,
    )

    return pl.pallas_call(
        _shrinkage_se_kernel,
        out_shape=jax.ShapeDtypeStruct((B, C, L), x.dtype),
        grid=grid,
        in_specs=[
            pl.BlockSpec((block_b, C, L), lambda i: (i, 0, 0)),
            pl.BlockSpec((C, C), lambda i: (0, 0)),
            pl.BlockSpec((1, C), lambda i: (0, 0)),
            pl.BlockSpec((C, C), lambda i: (0, 0)),
            pl.BlockSpec((1, C), lambda i: (0, 0)),
        ],
        out_specs=pl.BlockSpec((block_b, C, L), lambda i: (i, 0, 0)),
        compiler_params=pltpu.CompilerParams(
            dimension_semantics=("parallel",),
            vmem_limit_bytes=64 * 1024 * 1024,
        ),
        cost_estimate=cost,
    )(x, w1, b1, w2, b2)


def shrinkage_se_ref(x, w1, b1, w2, b2):
    """Pure-JAX reference mirroring the PyTorch forward."""
    x_abs = jnp.abs(x)
    avg = jnp.mean(x_abs, axis=-1)
    h = jnp.maximum(avg @ w1 + b1, 0.0)
    t = jax.nn.sigmoid(h @ w2 + b2)
    thr = (avg * t)[:, :, None]
    return jnp.sign(x) * jnp.maximum(x_abs - thr, 0.0)


if __name__ == "__main__":
    # Small shapes consistent with the module: channel must be >= 16
    # (Linear(channel, channel // 16) in __init__), so C = 32.
    B, C, L = 2, 32, 128

    key = jax.random.PRNGKey(0)
    kx, k1, k2, k3, k4 = jax.random.split(key, 5)

    x = jax.random.normal(kx, (B, C, L), dtype=jnp.float32)

    # Deterministic "fc" parameters.  PyTorch Linear weight is (out, in);
    # we store them pre-transposed as (in, out) for row-major matmul.
    scale = 1.0 / jnp.sqrt(jnp.float32(C))
    w1 = jax.random.uniform(k1, (C, C), jnp.float32, -1.0, 1.0) * scale
    b1 = jax.random.uniform(k2, (1, C), jnp.float32, -1.0, 1.0) * scale
    w2 = jax.random.uniform(k3, (C, C), jnp.float32, -1.0, 1.0) * scale
    b2 = jax.random.uniform(k4, (1, C), jnp.float32, -1.0, 1.0) * scale

    out = shrinkage_se(x, w1, b1, w2, b2)
    out = jax.block_until_ready(out)

    ref = shrinkage_se_ref(x, w1, b1, w2, b2)
    assert out.shape == (B, C, L)
    assert jnp.allclose(out, ref, atol=1e-5, rtol=1e-5), "mismatch vs reference"

    print("KERNEL_OK")
</pallas_src>

<mosaic_0001>
module attributes {stable_mosaic.version = 11 : i64} {
  func.func @_shrinkage_se_kernel(%arg0: i32, %arg1: memref<1x32x128xf32, #tpu.memory_space<vmem>>, %arg2: memref<32x32xf32, #tpu.memory_space<vmem>>, %arg3: memref<1x32xf32, #tpu.memory_space<vmem>>, %arg4: memref<32x32xf32, #tpu.memory_space<vmem>>, %arg5: memref<1x32xf32, #tpu.memory_space<vmem>>, %arg6: memref<1x32x128xf32, #tpu.memory_space<vmem>>) attributes {dimension_semantics = [#tpu.dimension_semantics<parallel>], iteration_bounds = array<i64: 2>, scalar_prefetch = 0 : i64, scratch_operands = 0 : i64, tpu.core_type = #tpu.core_type<tc>, window_params = [{transform_indices = @transform_0, window_bounds = array<i64: 1, 32, 128>}, {pipeline_mode = #tpu.pipeline_mode<synchronous>, transform_indices = @transform_1, window_bounds = array<i64: 32, 32>}, {pipeline_mode = #tpu.pipeline_mode<synchronous>, transform_indices = @transform_2, window_bounds = array<i64: 1, 32>}, {pipeline_mode = #tpu.pipeline_mode<synchronous>, transform_indices = @transform_3, window_bounds = array<i64: 32, 32>}, {pipeline_mode = #tpu.pipeline_mode<synchronous>, transform_indices = @transform_4, window_bounds = array<i64: 1, 32>}, {transform_indices = @transform_5, window_bounds = array<i64: 1, 32, 128>}]} {
    %c0 = arith.constant 0 : index
    %c0_0 = arith.constant 0 : index
    %c0_1 = arith.constant 0 : index
    %0 = vector.load %arg1[%c0, %c0_0, %c0_1] : memref<1x32x128xf32, #tpu.memory_space<vmem>>, vector<1x32x128xf32>
    %1 = math.absf %0 : vector<1x32x128xf32>
    %cst = arith.constant dense<0.000000e+00> : vector<1x32xf32>
    %2 = vector.multi_reduction <add>, %1, %cst [2] : vector<1x32x128xf32> to vector<1x32xf32>
    %cst_2 = arith.constant 1.280000e+02 : f32
    %3 = vector.broadcast %cst_2 : f32 to vector<1x32xf32>
    %4 = arith.divf %2, %3 : vector<1x32xf32>
    %c0_3 = arith.constant 0 : index
    %c0_4 = arith.constant 0 : index
    %5 = vector.load %arg2[%c0_3, %c0_4] : memref<32x32xf32, #tpu.memory_space<vmem>>, vector<32x32xf32>
    %cst_5 = arith.constant dense<0.000000e+00> : vector<1x32xf32>
    %6 = tpu.matmul %4, %5, %cst_5 {dimension_numbers = #tpu.dot_dimension_numbers<[1], [0], [0], [1], [0, 0, 1, 1], [], []>} : vector<1x32xf32>, vector<32x32xf32>, vector<1x32xf32> -> vector<1x32xf32>
    %c0_6 = arith.constant 0 : index
    %c0_7 = arith.constant 0 : index
    %7 = vector.load %arg3[%c0_6, %c0_7] : memref<1x32xf32, #tpu.memory_space<vmem>>, vector<1x32xf32>
    %8 = arith.addf %6, %7 : vector<1x32xf32>
    %cst_8 = arith.constant 0.000000e+00 : f32
    %9 = vector.broadcast %cst_8 : f32 to vector<1x32xf32>
    %10 = arith.maximumf %8, %9 : vector<1x32xf32>
    %c0_9 = arith.constant 0 : index
    %c0_10 = arith.constant 0 : index
    %11 = vector.load %arg4[%c0_9, %c0_10] : memref<32x32xf32, #tpu.memory_space<vmem>>, vector<32x32xf32>
    %cst_11 = arith.constant dense<0.000000e+00> : vector<1x32xf32>
    %12 = tpu.matmul %10, %11, %cst_11 {dimension_numbers = #tpu.dot_dimension_numbers<[1], [0], [0], [1], [0, 0, 1, 1], [], []>} : vector<1x32xf32>, vector<32x32xf32>, vector<1x32xf32> -> vector<1x32xf32>
    %c0_12 = arith.constant 0 : index
    %c0_13 = arith.constant 0 : index
    %13 = vector.load %arg5[%c0_12, %c0_13] : memref<1x32xf32, #tpu.memory_space<vmem>>, vector<1x32xf32>
    %14 = arith.addf %12, %13 : vector<1x32xf32>
    %15 = arith.negf %14 : vector<1x32xf32>
    %16 = math.exp %15 : vector<1x32xf32>
    %cst_14 = arith.constant 1.000000e+00 : f32
    %17 = vector.broadcast %cst_14 : f32 to vector<1x32xf32>
    %18 = arith.addf %17, %16 : vector<1x32xf32>
    %19 = arith.divf %17, %18 : vector<1x32xf32>
    %20 = arith.mulf %4, %19 : vector<1x32xf32>
    %21 = vector.shape_cast %20 : vector<1x32xf32> to vector<1x32x1xf32>
    %22 = vector.broadcast %21 : vector<1x32x1xf32> to vector<1x32x128xf32>
    %23 = arith.subf %1, %22 : vector<1x32x128xf32>
    %cst_15 = arith.constant 0.000000e+00 : f32
    %24 = vector.broadcast %cst_15 : f32 to vector<1x32x128xf32>
    %25 = arith.maximumf %23, %24 : vector<1x32x128xf32>
    %cst_16 = arith.constant 0.000000e+00 : f32
    %26 = vector.broadcast %cst_16 : f32 to vector<1x32x128xf32>
    %27 = arith.cmpf oge, %0, %26 : vector<1x32x128xf32>
    %cst_17 = arith.constant 0.000000e+00 : f32
    %28 = vector.broadcast %cst_17 : f32 to vector<1x32x128xf32>
    %29 = arith.subf %28, %25 : vector<1x32x128xf32>
    %30 = arith.select %27, %25, %29 : vector<1x32x128xi1>, vector<1x32x128xf32>
    %c0_18 = arith.constant 0 : index
    %c0_19 = arith.constant 0 : index
    %c0_20 = arith.constant 0 : index
    %31 = vector.load %arg6[%c0_18, %c0_19, %c0_20] : memref<1x32x128xf32, #tpu.memory_space<vmem>>, vector<1x32x128xf32>
    tpu.vector_store %arg6[%c0_18, %c0_19, %c0_20], %30 {strides = array<i32>} : memref<1x32x128xf32, #tpu.memory_space<vmem>>, vector<1x32x128xf32>,
    return
  }
  func.func @transform_0(%arg0: i32) -> (i32, i32, i32) {
    %c0_i32 = arith.constant 0 : i32
    %c0_i32_0 = arith.constant 0 : i32
    %c0_i32_1 = arith.constant 0 : i32
    return %arg0, %c0_i32, %c0_i32_0 : i32, i32, i32
  }
  func.func @transform_1(%arg0: i32) -> (i32, i32) {
    %c0_i32 = arith.constant 0 : i32
    %c0_i32_0 = arith.constant 0 : i32
    %c0_i32_1 = arith.constant 0 : i32
    return %c0_i32, %c0_i32_0 : i32, i32
  }
  func.func @transform_2(%arg0: i32) -> (i32, i32) {
    %c0_i32 = arith.constant 0 : i32
    %c0_i32_0 = arith.constant 0 : i32
    %c0_i32_1 = arith.constant 0 : i32
    return %c0_i32, %c0_i32_0 : i32, i32
  }
  func.func @transform_3(%arg0: i32) -> (i32, i32) {
    %c0_i32 = arith.constant 0 : i32
    %c0_i32_0 = arith.constant 0 : i32
    %c0_i32_1 = arith.constant 0 : i32
    return %c0_i32, %c0_i32_0 : i32, i32
  }
  func.func @transform_4(%arg0: i32) -> (i32, i32) {
    %c0_i32 = arith.constant 0 : i32
    %c0_i32_0 = arith.constant 0 : i32
    %c0_i32_1 = arith.constant 0 : i32
    return %c0_i32, %c0_i32_0 : i32, i32
  }
  func.func @transform_5(%arg0: i32) -> (i32, i32, i32) {
    %c0_i32 = arith.constant 0 : i32
    %c0_i32_0 = arith.constant 0 : i32
    %c0_i32_1 = arith.constant 0 : i32
    return %arg0, %c0_i32, %c0_i32_0 : i32, i32, i32
  }
}

</mosaic_0001>

<bundles_post_ra>
// kernel: tpu_custom_call.1
= control target key start
LH: loop header
LB: loop body
LE: loop exit
PB: predicated region body
PF: predicated region fallthrough
CT: control target
= control target key end

     0   :  { %10 = vsyncpa [#allocation3], 0  ;;  %s1102_s0 = inlined_call_operand.hbm [shape: f32[2,32,128], index: 0, kind: input, shape index: {}]   ;;  %s1103_s1 = inlined_call_operand.hbm [shape: f32[32,32], index: 1, kind: input, shape index: {}]   ;;  %s1104_s2 = inlined_call_operand.vmem [shape: f32[1,32], index: 2, kind: input, shape index: {}]   ;;  %s1105_s3 = inlined_call_operand.hbm [shape: f32[32,32], index: 3, kind: input, shape index: {}]   ;;  %s1106_s4 = inlined_call_operand.vmem [shape: f32[1,32], index: 4, kind: input, shape index: {}]   ;;  %s1107_s5 = inlined_call_operand.hbm [shape: f32[2,32,128], index: 5, kind: output, shape index: {}]  }
   0x1   :  { %12 = vsyncpa [#allocation3 + $0x1], 0 }
   0x2   :  { %13 = vsyncpa [#allocation6], 0 }
   0x3   :  { %14 = vsyncpa [#allocation4], 0 }
   0x4   :  { %16 = vsyncpa [#allocation4 + $0x1], 0  ;;  %s894_s18 = smov 0   ;;  %s896_s19 = smov 0  }
   0x5   :  { %s898_s20 = smov 0   ;;  %s900_s21 = smov 0  }
   0x6 LB: > { %s915_s22 = sadd.s32 4294967295, %s854_s21   ;;  %s586_s23 = sadd.s32 4294967294, %s854_s21   ;;  %s854_s21 = sphi %s900_s21, %s1119_s21   ;;  %s850_s20 = sphi %s898_s20, %s1118_s20   ;;  %s846_s19 = sphi %s896_s19, %s1117_s19   ;;  %s842_s18 = sphi %s894_s18, %s1116_s18  }
   0x7   : > { %p42_p0 = scmp.ne.s32.totalorder %s846_s19, %s842_s18  ;;  %p43_p1 = scmp.eq.s32.totalorder %s915_s22, 0 }
   0x8   : > { %p150_p2 = scmp.eq.s32.totalorder %s915_s22, 1  ;;  %p156_p3 = scmp.eq.s32.totalorder %s586_s23, 1 }
   0x9   : > { %p924_p4 = por %p43_p1, %p42_p0  ;;  %p587_p5 = scmp.ge.s32.totalorder %s854_s21, 1 }
   0xa   : > { %p929_p6 = por %p156_p3, %p42_p0  ;;  %p163_p7 = scmp.lt.s32.totalorder %s854_s21, 3 }
   0xb   : > { %s174_s28 = sshll.u32 %s1103_s1, 4  ;;  %s856_s30 = smov [#allocation5]   ;;  %s175_s28 = int_to_ptr.hbm [resolvable:$true] %s174_s28 }
   0xc   : > { %p937_p8 = pnand %p587_p5, %p163_p7  ;;  %s176_s6 = sshll.u32 %s856_s30, 4  ;;  %s177_s6 = int_to_ptr.vmem [resolvable:$true] %s176_s6 }
   0xd   : > { %s191_s9 = sshll.u32 %s1105_s3, 4  ;;  %s1108_s10 = smov 128   ;;  %s192_s9 = int_to_ptr.hbm [resolvable:$true] %s191_s9 }
   0xe   : > { %p621_p9 = pneg %p937_p8  ;;  %s858_s11 = smov 8  }
   0xf   : > { %s859_s12 = smov [#allocation7]   ;;  %s956_s14 = sadd.s32 1, %s854_s21  }
  0x10   : > { %p622_p10 = pnand %p621_p9, %p43_p1  ;;  %s193_s13 = sshll.u32 %s859_s12, 4  ;;  %s194_s13 = int_to_ptr.vmem [resolvable:$true] %s193_s13 }
  0x11   : > { %s29_s15 = sadd.s32 1, %s850_s20  ;;  %s26_s16 = ssub.s32 %s854_s21, %s956_s14 }
  0x12   : > { %624 = dma.hbm_to_vmem [thread:$0]  (!%p622_p10), %s175_s28, 512, %s177_s6, [#allocation6], %s1108_s10, %s1108_s10, %s858_s11  }
  0x13   : > { %627 = dma.hbm_to_vmem [thread:$0]  (!%p622_p10), %s192_s9, 512, %s194_s13, [#allocation6], %s1108_s10, %s1108_s10, %s858_s11  }
  0x14   : > { %p36_p12 = scmp.ne.s32.totalorder %s850_s20, %s846_s19  ;;  %p27_p13 = scmp.eq.s32.totalorder %s26_s16, 0 }
  0x15   : > { %p37_p0 = scmp.eq.s32.totalorder %s854_s21, 0  ;;  %p638_p5 = scmp.lt.s32.totalorder %s854_s21, 2 }
  0x16   : > { %p966_p3 = por %p150_p2, %p36_p12  ;;  %s210_s26 = sand.u32 1, %s850_s20  }
  0x17   : > { %s972_s23 = scalar_select %p27_p13, %s850_s20, %s29_s15  }
  0x18   : > { %p38_p7 = por %p37_p0, %p36_p12  ;;  %s591_s27 = sshll.u32 %s210_s26, 5 }
  0x19   : > { %s607_s28 = sshll.u32 %s854_s21, 5  ;;  %s214_s8 = scalar_lea.vmem [#allocation2], %s591_s27 }
  0x1a   : > { %s219_s7 = scalar_lea.hbm %s1102_s0, %s607_s28  ;;  %s222_s9 = sshll.u32 %s214_s8, 4  ;;  %s223_s9 = int_to_ptr.vmem [resolvable:$true] %s222_s9 }
  0x1b   : > { %s220_s12 = sshll.u32 %s219_s7, 4  ;;  %p979_p2 = pnand %p638_p5, %p38_p7  ;;  %s221_s12 = int_to_ptr.hbm [resolvable:$true] %s220_s12 }
  0x1c   : > { %s211_s15 = scalar_lea.sflag [#allocation3], %s210_s26  ;;  %s754_s16 = sshra.s32 %s221_s12, 4  ;;  %s755_s16 = int_to_ptr.hbm [resolvable:$true] %s754_s16 }
  0x1d   : > { %s756_s10 = scalar_lea.hbm %s755_s16, 32  ;;  %p758_p10 = pneg %p979_p2 }
  0x1e   : > { %p757_p9 = scmp.ne.s32.totalorder %s755_s16, %s756_s10  ;;  %s761_s30 = scalar_lea.hbm %s1102_s0, 64 }
  0x1f   : > { %p762_p0 = scmp.lt.s32.totalorder %s755_s16, %s1102_s0  ;;  %p763_p5 = scmp.lt.s32.totalorder %s761_s30, %s756_s10 }
  0x20   : > { %p759_p12 = pnand %p758_p10, %p757_p9 }
  0x21   : > { %p764_p7 = por %p763_p5, %p762_p0 }
  0x22   : > { %p760_p13 = pneg %p759_p12 }
  0x24   : > { %p765_p11 = pnand %p764_p7, %p760_p13 }
  0x26   : > { %768 = shalt.err (!%p765_p11)
}
  0x27   : > { %s1114_s26 = smov 128   ;;  %234 = sbr.rel (%p937_p8) target bundleno = 697 (0x2b9), region = 40 }
  0x28   : > { %631 = dma.hbm_to_vmem [thread:$0]  (!%p979_p2), %s221_s12, 512, %s223_s9, %s211_s15, %s1114_s26, %s1114_s26, %s858_s11  }
  0x29   : > { %s999_s8 = sand.u32 (!%p937_p8), 1, %s846_s19  }
  0x2a   : > { %s595_s10 = sshll.u32 (!%p937_p8), %s999_s8, 5  ;;  %s237_s16 = scalar_lea.sflag (!%p937_p8), [#allocation3], %s999_s8 }
  0x2b   : > { %s240_s28 = scalar_lea.vmem (!%p937_p8), [#allocation2], %s595_s10 }
  0x2c   : > { %829 = dma.done.wait (%p924_p4), %s237_s16, 512  }
  0x2d   : > { %831 = vsyncadd (%p924_p4), %s237_s16, 4294966784 }
  0x2e   : > { %833 = dma.done.wait (%p43_p1), [#allocation6], 1024  }
  0x2f   : > { %835 = vsyncadd (%p43_p1), [#allocation6], 4294966272  ;;  %v1013_v0 = vld [vmem:[%s240_s28] sm:$0xff]  ;;  %v1015_v1 = vld [vmem:[%s240_s28 + $0x10] sm:$0xff]  ;;  %v860_v10 = vmov 128.0   ;;  %v314_v19 = vlaneseq  ;;  %vm319_vm1 = vcmask 130112  }
  0x30   : > { %v282_v2 = vand.u32 2147483647, %v1013_v0  ;;  %v284_v3 = vand.u32 2147483647, %v1015_v1  ;;  %v1023_v4 = vld [vmem:[%s240_s28 + $0x8] sm:$0xff]  ;;  %v1025_v5 = vld [vmem:[%s240_s28 + $0x18] sm:$0xff]  ;;  %688 = vrcp.f32 %v860_v10 }
  0x31   : > { %v283_v6 = vand.u32 2147483647, %v1023_v4  ;;  %v285_v7 = vand.u32 2147483647, %v1025_v5  ;;  %v308_v8 = vld [vmem:[#allocation5 + $0x18] sm:$0xff]  ;;  %v307_v9 = vld [vmem:[#allocation5 + $0x10] sm:$0xff] }
  0x32   : > { %286 = vadd.xlane.f32.xlu0 %v282_v2  ;;  %290 = vadd.xlane.f32.xlu1 %v284_v3  ;;  %v306_v11 = vld [vmem:[#allocation5 + $0x8] sm:$0xff]  ;;  %v305_v12 = vld [vmem:[#allocation5] sm:$0xff]  ;;  %v356_v13 = vld [vmem:[#allocation7 + $0x18] sm:$0xff]  ;;  %v315_v23 = vand.u32 127, %v314_v19  ;;  %vm323_vm2 = vcmask 195712   ;;  %vm327_vm3 = vcmask 261312  }
  0x33   : > { %344 = vmatpush.msra.mxu0 %v308_v8  ;;  %373 = vmatpush.msra.mxu1 %v356_v13  ;;  %vm329_vm4 = vcmask 261120   ;;  %v355_v40 = vld [vmem:[#allocation7 + $0x10] sm:$0xff]  ;;  %v354_v41 = vld [vmem:[#allocation7 + $0x8] sm:$0xff]  ;;  %v353_v42 = vld [vmem:[#allocation7] sm:$0xff]  ;;  %v403_v47 = vshrl.u32 %v314_v19, 7  ;;  %vm462_vm9 = vcmp.ge.f32.partialorder %v1013_v0, 0.0 }
  0x34   : > { %v317_v25 = vadd.s32 4294967288, %v315_v23  ;;  %v325_v26 = vadd.s32 4294967272, %v315_v23  ;;  %v321_v27 = vadd.s32 4294967280, %v315_v23  ;;  %v309_v43 = vld [vmem:[%s1104_s2] sm:$0x1]  ;;  %s277_s12 = scalar_lea.vmem [#allocation8], %s595_s10 }
  0x35   : > { %345 = vmatpush.msra.mxu0 %v307_v9  ;;  %374 = vmatpush.msra.mxu1 %v355_v40  ;;  %v422_v48 = vadd.s32 24, %v403_v47  ;;  %v416_v49 = vadd.s32 16, %v403_v47  ;;  %v357_v50 = vld [vmem:[%s1106_s4] sm:$0x1]  ;;  %vm463_vm10 = vcmp.ge.f32.partialorder %v1023_v4, 0.0  ;;  %vm464_vm11 = vcmp.ge.f32.partialorder %v1015_v1, 0.0 }
  0x36   : > { %v689_v14 = vpop.eup %688  ;;  %682 = vset.pattern.permute.xlu2 %v403_v47  ;;  %s608_s13 = sshll.u32 %s915_s22, 5  ;;  %s491_s6 = sshll.u32 %s277_s12, 4  ;;  %vm465_vm12 = vcmp.ge.f32.partialorder %v1025_v5, 0.0  ;;  %s492_s6 = int_to_ptr.vmem [resolvable:$true] %s491_s6 }
  0x37   : > { %346 = vmatpush.msra.mxu0 %v306_v11  ;;  %v295_v15 = vmul.f32 128.0, %v689_v14  ;;  %vm299_vm0 = vweird.f32 %v689_v14  ;;  %375 = vmatpush.msra.mxu1 %v354_v41  ;;  %v410_v11 = vadd.s32 8, %v403_v47  ;;  %s490_s30 = scalar_lea.hbm %s1107_s5, %s608_s13  ;;  %s479_s22 = scalar_lea.sflag [#allocation4], %s999_s8 }
  0x38   : > { %685 = vset.pattern.permute.xlu1 %v422_v48  ;;  %684 = vset.pattern.permute.xlu0 %v416_v49  ;;  %s493_s7 = sshll.u32 %s490_s30, 4  ;;  %s804_s24 = scalar_lea.hbm %s1107_s5, 64  ;;  %s494_s7 = int_to_ptr.hbm [resolvable:$true] %s493_s7 }
  0x39   : > { %347 = vmatpush.msra.mxu0 %v305_v12  ;;  %v296_v16 = vsub.f32 1.0, %v295_v15  ;;  %376 = vmatpush.msra.mxu1 %v353_v42  ;;  %v861_v12 = vmov 0   ;;  %s798_s26 = sshra.s32 %s494_s7, 4  ;;  %s799_s26 = int_to_ptr.hbm [resolvable:$true] %s798_s26 }
  0x3a   : > { %288 = vadd.xlane.f32.xlu0 %v283_v6  ;;  %292 = vadd.xlane.f32.xlu1 %v285_v7  ;;  %s800_s10 = scalar_lea.hbm %s799_s26, 32  ;;  %p805_p11 = scmp.lt.s32.totalorder %s799_s26, %s1107_s5 }
  0x3b   : > { %v297_v17 = vmul.f32 %v689_v14, %v296_v16  ;;  %p801_p1 = scmp.ne.s32.totalorder %s799_s26, %s800_s10  ;;  %p806_p2 = scmp.lt.s32.totalorder %s804_s24, %s800_s10 }
  0x3d   : > { %v298_v18 = vadd.f32 %v689_v14, %v297_v17  ;;  %p802_p4 = pnand %p801_p1, %p966_p3  ;;  %p807_p9 = por %p806_p2, %p805_p11 }
  0x3f   : > { %v300_v22 = vsel %vm299_vm0, %v689_v14, %v298_v18  ;;  %p803_p8 = pneg %p802_p4 }
  0x41   : > { %p808_p10 = pnand %p807_p9, %p803_p8 }
  0xa5   : > { %v287_v20 = vpop.xlane.xlu0 %286  ;;  %v291_v21 = vpop.xlane.xlu1 %290 }
  0xa6   : > { %v1033_v24 = vmul.f32 %v300_v22, %v287_v20  ;;  %v1035_v28 = vmul.f32 %v300_v22, %v291_v21 }
  0xa8   : > { %v316_v33 = vperm.slane %v1033_v24, %v315_v23  ;;  %v322_v36 = vperm.slane %v1035_v28, %v321_v27 }
  0xad   : > { %v289_v29 = vpop.xlane.xlu0 %288  ;;  %v293_v30 = vpop.xlane.xlu1 %292 }
  0xae   : > { %v1037_v31 = vmul.f32 %v300_v22, %v289_v29  ;;  %v1039_v32 = vmul.f32 %v300_v22, %v293_v30 }
  0xb0   : > { %v318_v34 = vperm.slane %v1037_v31, %v317_v25  ;;  %v326_v35 = vperm.slane %v1039_v32, %v325_v26 }
  0xb2   : > { %v320_v37 = vsel %vm319_vm1, %v318_v34, %v316_v33 }
  0xb3   : > { %v324_v38 = vsel %vm323_vm2, %v322_v36, %v320_v37 }
  0xb4   : > { %v328_v39 = vsel %vm327_vm3, %v326_v35, %v324_v38 }
  0xb5   : > { %599 = vmatmul.msk.f32.vlgmr.msra.gmra.mxu0 %vm329_vm4, %v328_v39 }
 0x132   : > { %v349_v44 = vpop.f32.mrf.mxu0 }
 0x133   : > { %v350_v45 = vadd.f32 %v349_v44, %v309_v43 }
 0x135   : > { %v352_v46 = vmax.f32 %v350_v45, 0.0 }
 0x137   : > { %600 = vmatmul.msk.f32.vlgmr.msra.gmra.mxu1 %vm329_vm4, %v352_v46 }
 0x1b4   : > { %v378_v51 = vpop.f32.mrf.mxu1 }
 0x1b5   : > { %v379_v52 = vadd.f32 %v378_v51, %v357_v50 }
 0x1b7   : > { %v601_v53 = vmul.f32 -1.442695, %v379_v52 }
 0x1b9   : > { %690 = vpow2.f32 %v601_v53 }
 0x1bf   : > { %v691_v54 = vpop.eup %690 }
 0x1c0   : > { %v384_v55 = vadd.f32 1.0, %v691_v54 }
 0x1c2   : > { %692 = vrcp.f32 %v384_v55  ;;  %v396_v59 = vand.u32 2147483648, %v384_v55  ;;  %v394_v61 = vand.u32 2147483647, %v384_v55  ;;  %vm390_vm6 = vweird.f32 %v384_v55 }
 0x1c4   : > { %v397_v63 = vor.u32 1.1754944e-38, %v396_v59  ;;  %vm395_vm8 = vcmp.eq.f32.partialorder %v394_v61, 8.507059e+37 }
 0x1c8   : > { %v693_v56 = vpop.eup %692 }
 0x1c9   : > { %v386_v57 = vmul.f32 %v693_v56, %v384_v55  ;;  %vm391_vm5 = vweird.f32 %v693_v56 }
 0x1ca   : > { %vm392_vm7 = vmor %vm390_vm6, %vm391_vm5 }
 0x1cb   : > { %v387_v58 = vsub.f32 1.0, %v386_v57 }
 0x1cd   : > { %v388_v60 = vmul.f32 %v693_v56, %v387_v58 }
 0x1cf   : > { %v389_v62 = vadd.f32 %v693_v56, %v388_v60 }
 0x1d1   : > { %v393_v8 = vsel %vm392_vm7, %v693_v56, %v389_v62 }
 0x1d2   : > { %v398_v9 = vsel %vm395_vm8, %v397_v63, %v393_v8 }
 0x1d3   : > { %v401_v10 = vperm.slane %v398_v9, 0 }
 0x1d5   : > { %424 = vperm.xlu1 %685, %v401_v10   ;;  %418 = vperm.xlu0 %684, %v401_v10  }
 0x1d6   : > { %406 = vperm.xlu2 %682, %v401_v10  }
 0x1dd   : > { %687 = vset.pattern.permute.xlu0 %v861_v12 }
 0x1de   : > { %683 = vset.pattern.permute.xlu2 %v410_v11 }
 0x1e6   : > { %412 = vperm.xlu2 %683, %v401_v10  }
 0x1ee   : > { %686 = vset.pattern.permute.xlu2 %v861_v12 }
 0x230   : > { %v407_v13 = vpop.permute.xlu2 %406 }
 0x231   : > { %v430_v14 = vmul.f32 %v407_v13, %v1033_v24 }
 0x233   : > { %436 = vperm.xlu2 %686, %v430_v14  }
 0x240   : > { %v413_v15 = vpop.permute.xlu2 %412 }
 0x241   : > { %v431_v16 = vmul.f32 %v413_v15, %v1037_v31 }
 0x243   : > { %441 = vperm.xlu2 %686, %v431_v16  }
 0x247   : > { %v419_v17 = vpop.permute.xlu0 %418  ;;  %v425_v19 = vpop.permute.xlu1 %424 }
 0x248   : > { %v432_v18 = vmul.f32 %v419_v17, %v1035_v28  ;;  %v433_v20 = vmul.f32 %v425_v19, %v1039_v32 }
 0x24b   : > { %446 = vperm.xlu2 %686, %v432_v18  }
 0x253   : > { %451 = vperm.xlu2 %686, %v433_v20  }
 0x28d   : > { %v437_v21 = vpop.permute.xlu2 %436 }
 0x28e   : > { %v454_v22 = vsub.f32 %v282_v2, %v437_v21 }
 0x290   : > { %v458_v23 = vmax.f32 %v454_v22, 0.0 }
 0x292   : > { %v466_v24 = vsub.f32 0.0, %v458_v23 }
 0x294   : > { %v470_v25 = vsel %vm462_vm9, %v458_v23, %v466_v24 }
 0x295   : > { %474 = vst [vmem:[%s277_s12] sm:$0xff] %v470_v25 }
 0x29d   : > { %v442_v26 = vpop.permute.xlu2 %441 }
 0x29e   : > { %v455_v27 = vsub.f32 %v283_v6, %v442_v26 }
 0x2a0   : > { %v459_v28 = vmax.f32 %v455_v27, 0.0 }
 0x2a2   : > { %v467_v29 = vsub.f32 0.0, %v459_v28 }
 0x2a4   : > { %v471_v30 = vsel %vm463_vm10, %v459_v28, %v467_v29 }
 0x2a5   : > { %475 = vst [vmem:[%s277_s12 + $0x8] sm:$0xff] %v471_v30  ;;  %v447_v2 = vpop.permute.xlu2 %446 }
 0x2a6   : > { %v456_v0 = vsub.f32 %v284_v3, %v447_v2 }
 0x2a8   : > { %v460_v31 = vmax.f32 %v456_v0, 0.0 }
 0x2aa   : > { %v468_v32 = vsub.f32 0.0, %v460_v31 }
 0x2ac   : > { %v472_v33 = vsel %vm464_vm11, %v460_v31, %v468_v32 }
 0x2ad   : > { %476 = vst [vmem:[%s277_s12 + $0x10] sm:$0xff] %v472_v33  ;;  %v452_v4 = vpop.permute.xlu2 %451 }
 0x2ae   : > { %v457_v6 = vsub.f32 %v285_v7, %v452_v4 }
 0x2b0   : > { %v461_v3 = vmax.f32 %v457_v6, 0.0 }
 0x2b2   : > { %v469_v1 = vsub.f32 0.0, %v461_v3 }
 0x2b4   : > { %v473_v34 = vsel %vm465_vm12, %v461_v3, %v469_v1 }
 0x2b5   : > { %477 = vst [vmem:[%s277_s12 + $0x18] sm:$0xff] %v473_v34 }
 0x2b6   : > { %811 = shalt.err (!%p808_p10)
}
 0x2b7   : > { %s862_s8 = smov 128   ;;  %s863_s9 = smov 8  }
 0x2b8   : > { %619 = dma.vmem_to_hbm [thread:$0]  (%p966_p3), %s492_s6, 512, %s494_s7, %s479_s22, %s862_s8, %s862_s8, %s863_s9  }
 0x2b9 PF: > { %s508_s12 = sand.u32 1, %s842_s18   ;;  %p1115_p12 = scmp.ge.s32.totalorder %s854_s21, 2 }
 0x2ba   : > { %s509_s13 = scalar_lea.sflag [#allocation4], %s508_s12 }
 0x2bb   : > { %p633_p13 = pnand %p1115_p12, %p929_p6 }
 0x2bd   : > { %p634_p0 = pneg %p633_p13 }
 0x2bf   : > { %837 = dma.done.wait (%p634_p0), %s509_s13, 512  }
 0x2c0   : > { %839 = vsyncadd (%p634_p0), %s509_s13, 4294966784  ;;  %p19_p5 = scmp.ge.s32.totalorder %s956_s14, 4   ;;  %s1116_s18 = smov %s846_s19 }
 0x2c1   : > { %s1117_s19 = smov %s850_s20  ;;  %s1118_s20 = smov %s972_s23 }
 0x2c2   : > { %s1119_s21 = smov %s956_s14  ;;  %21 = sbr.rel (!%p19_p5) target bundleno = 6 (0x6), region = 93 }
 0x2c7   :  { %515 = vsyncpa [#allocation3], 1 }
 0x2c8   :  { %517 = vsyncpa [#allocation3 + $0x1], 1 }
 0x2c9   :  { %518 = vsyncpa [#allocation6], 1 }
 0x2ca   :  { %519 = vsyncpa [#allocation4], 1 }
 0x2cb   :  { %521 = vsyncpa [#allocation4 + $0x1], 1 }

</bundles_post_ra>
